<compile_context>
chip_gen: v5e
topology: v5e:2x2
jax: 0.10.0
libtpu: 0.0.40
codegen_flags: <defaults>
</compile_context>

<pallas_src>
import jax
import jax.numpy as jnp
import numpy as np
from jax import lax
from jax.experimental import pallas as pl
from jax.experimental.pallas import tpu as pltpu


def _residual_block_kernel(x_ref, w1_ref, w2_ref, f_ref, b3_ref, o_ref):
    # Block layouts (WCo = W * Cout, all lane-dense on the 128-lane axis):
    #   x_ref:  (Nb, H, WCo)      f32  NHWC activations, channels zero-padded to Cout
    #                                  (== the IdentityPadding shortcut)
    #   w1_ref: (3*WCo, WCo)      bf16 conv1 band-Toeplitz RHS (bn1/bn2 scales folded)
    #   w2_ref: (3*WCo, WCo)      bf16 conv2 band-Toeplitz RHS (bn3 scale folded)
    #   f_ref:  (H, WCo)          f32  bn1-shift-through-conv1 bias field + bn2 shift
    #   b3_ref: (1, WCo)          f32  bn3 shift tiled along W
    #   o_ref:  (Nb, H, WCo)      f32  lane-dense output slab
    Nb, H, WCo = x_ref.shape

    x = x_ref[...]                              # f32; reused verbatim as the shortcut
    xb = x.astype(jnp.bfloat16)                 # cast FIRST: tap building is all-bf16

    def lhs_3h(v):
        # Build the matmul LHS: for each output row (n, h) concatenate the three
        # kh taps [v[h-1], v[h], v[h+1]] on the lane axis (zeros outside [0, H)).
        # The kw taps / W-border zeros are handled by the band-Toeplitz RHS, so no
        # (H+2, W+2) padded intermediate and no lane-sparse im2col relayout.
        z = jnp.zeros((Nb, 1, WCo), v.dtype)
        up = jnp.concatenate([z, v[:, : H - 1, :]], axis=1)   # row h -> v[h-1]
        dn = jnp.concatenate([v[:, 1:, :], z], axis=1)        # row h -> v[h+1]
        return jnp.concatenate([up, v, dn], axis=2).reshape(Nb * H, 3 * WCo)

    # ---- conv1 (bn1 scale + bn2 scale pre-folded into the RHS) ----
    h1 = jnp.dot(lhs_3h(xb), w1_ref[...],
                 preferred_element_type=jnp.float32)           # (Nb*H, WCo) f32
    h1 = h1.reshape(Nb, H, WCo)

    # ---- bn1 shift (pushed through conv1) + bn2 shift + relu, all lane-dense ----
    h1 = jnp.maximum(h1 + f_ref[...][None, :, :], 0.0).astype(jnp.bfloat16)

    # ---- conv2 (bn3 scale pre-folded into the RHS) ----
    h2 = jnp.dot(lhs_3h(h1), w2_ref[...],
                 preferred_element_type=jnp.float32)           # (Nb*H, WCo) f32

    # ---- epilogue: bn3 shift + shortcut, in the lane-dense output layout ----
    o_ref[...] = h2.reshape(Nb, H, WCo) + b3_ref[...] + x


def _fold_params(params, H, W):
    """Trace-time folding of the inference-mode BatchNorms into the conv weights.

    Returns
      w1s: (3,3,Cin,Cout)  conv1 weights with bn1 scale (per ci) and bn2 scale (per co)
      w2s: (3,3,Cout,Cout) conv2 weights with bn3 scale (per co)
      f  : (H,W,Cout)      border-aware bias field = conv(b1*ones, w1*s2) + b2
      b3 : (Cout,)         bn3 shift
    Exact in real arithmetic: scaling input/output channels of a bias-free conv
    commutes with the conv, and the b1 shift through the zero-padded conv is a
    data-independent (spatially varying near the border) bias field.
    """
    Cin, Cout = params["w1"].shape[2], params["w1"].shape[3]
    s1, b1 = params["s1"], params["b1"]
    s2, b2 = params["s2"], params["b2"]
    s3, b3 = params["s3"], params["b3"]

    w1s = params["w1"] * s1[None, None, :, None] * s2[None, None, None, :]
    w2s = params["w2"] * s3[None, None, None, :]

    b1_map = jnp.broadcast_to(b1, (1, H, W, Cin)).astype(jnp.float32)
    f = lax.conv_general_dilated(
        b1_map, params["w1"] * s2[None, None, None, :], (1, 1), [(1, 1), (1, 1)],
        dimension_numbers=("NHWC", "HWIO", "NHWC"),
        precision=lax.Precision.HIGHEST)[0] + b2                # (H, W, Cout)
    return w1s.astype(jnp.float32), w2s.astype(jnp.float32), f.astype(jnp.float32), b3


def _band_toeplitz_rhs(w_hwio, W):
    """Build the (3*W*C, W*Cout) band-Toeplitz-along-W matmul RHS for a 3x3 conv.

    Row index = kh*(W*C) + w_in*C + ci, column index = w_out*Cout + co;
    entry = w[kh, w_in-w_out+1, ci, co] when |w_in - w_out| <= 1, else 0.
    The zero off-band entries implement the W-direction zero padding exactly.
    """
    _, _, C, Co = w_hwio.shape
    blocks = []
    for kh in range(3):
        acc = jnp.zeros((W, C, W, Co), w_hwio.dtype)
        for kw in range(3):
            off = kw - 1                                   # w_in = w_out + off
            sel = jnp.eye(W, k=-off, dtype=w_hwio.dtype)   # ones at (w_in, w_in-off)
            acc = acc + sel[:, None, :, None] * w_hwio[kh, kw][None, :, None, :]
        blocks.append(acc.reshape(W * C, W * Co))
    return jnp.concatenate(blocks, axis=0)                 # (3*W*C, W*Co)


def residual_block(x_nchw, params, stride=1, block_n=None):
    """Pallas implementation of ResidualBlock.forward (NCHW in / NCHW out)."""
    if stride != 1:
        # TODO(synk): stride=2 (strided conv1 + ceil-mode AvgPool2d shortcut) not implemented.
        raise NotImplementedError("Only stride=1 is implemented in the Pallas kernel.")
    N, Cin, H, W = x_nchw.shape
    Cout = params["w1"].shape[-1]
    if Cout < Cin:
        raise NotImplementedError("IdentityPadding shortcut requires out_channels >= in_channels.")
    WCo = W * Cout

    # --- trace-time parameter prep (tiny; runs once outside the kernel) ---
    w1s, w2s, f, b3 = _fold_params(params, H, W)
    # Pad conv1's input channels to Cout with zero rows so conv1 and the shortcut
    # share one channel-padded, fully lane-dense activation layout (exact: zeros).
    w1p = jnp.pad(w1s, ((0, 0), (0, 0), (0, Cout - Cin), (0, 0)))
    rhs1 = _band_toeplitz_rhs(w1p, W).astype(jnp.bfloat16)      # (3*WCo, WCo)
    rhs2 = _band_toeplitz_rhs(w2s, W).astype(jnp.bfloat16)      # (3*WCo, WCo)
    f2 = f.reshape(H, WCo)                                      # (H, WCo) f32
    b3t = jnp.tile(b3, (W,)).reshape(1, WCo).astype(jnp.float32)

    # NCHW -> NHWC, zero-pad channels to Cout (== IdentityPadding), lane-dense slab.
    # (Layout plumbing only; it fuses with the transpose the wrapper needs anyway.)
    x = jnp.transpose(x_nchw, (0, 2, 3, 1)).astype(jnp.float32)
    x = jnp.pad(x, ((0, 0), (0, 0), (0, 0), (0, Cout - Cin))).reshape(N, H, WCo)

    # Batch blocking: target ~4K matmul rows per grid step (amortize ~0.35us/step),
    # stay under a ~24 MiB live-VMEM budget (fits v7x's 64 MiB physical VMEM with
    # double-buffered I/O and headroom), and keep >= 2 grid steps when N allows so
    # the v7x megacore can use both TensorCores.
    if block_n is None:
        bytes_per_n = H * WCo * 38          # ~38 live bytes per output element
        vmem_budget = 24 * 1024 * 1024
        block_n = 1
        while (N % (block_n * 2) == 0
               and N // (block_n * 2) >= 2
               and block_n * H * W < 4096
               and (block_n * 2) * bytes_per_n <= vmem_budget):
            block_n *= 2
    if N % block_n != 0:
        raise ValueError("block_n must divide N")
    grid_n = N // block_n

    out = pl.pallas_call(
        _residual_block_kernel,
        out_shape=jax.ShapeDtypeStruct((N, H, WCo), jnp.float32),
        grid_spec=pltpu.PrefetchScalarGridSpec(
            num_scalar_prefetch=0,
            grid=(grid_n,),
            in_specs=[
                pl.BlockSpec((block_n, H, WCo), lambda n: (n, 0, 0)),
                pl.BlockSpec((3 * WCo, WCo), lambda n: (0, 0)),
                pl.BlockSpec((3 * WCo, WCo), lambda n: (0, 0)),
                pl.BlockSpec((H, WCo), lambda n: (0, 0)),
                pl.BlockSpec((1, WCo), lambda n: (0, 0)),
            ],
            out_specs=pl.BlockSpec((block_n, H, WCo), lambda n: (n, 0, 0)),
        ),
        compiler_params=pltpu.CompilerParams(
            dimension_semantics=("parallel",),      # batch axis: megacore on v7x
            vmem_limit_bytes=48 * 1024 * 1024,      # > scoped defaults, < v7x physical
        ),
    )(x, rhs1, rhs2, f2, b3t)

    out = out.reshape(N, H, W, Cout)
    return jnp.transpose(out, (0, 3, 1, 2))                     # back to NCHW


def init_params(key, in_channels, out_channels, eps=1e-5):
    """Deterministic synthetic parameters (module shapes from __init__)."""
    ks = jax.random.split(key, 5)

    def bn_params(k, c):
        k1, k2, k3, k4 = jax.random.split(k, 4)
        gamma = jax.random.uniform(k1, (c,), jnp.float32, 0.5, 1.5)
        beta = 0.1 * jax.random.normal(k2, (c,), jnp.float32)
        mean = 0.1 * jax.random.normal(k3, (c,), jnp.float32)
        var = jax.random.uniform(k4, (c,), jnp.float32, 0.5, 1.5)
        scale = gamma / jnp.sqrt(var + eps)
        shift = beta - mean * scale
        return scale, shift

    s1, b1 = bn_params(ks[0], in_channels)       # bn1: BatchNorm2d(in_channels)
    s2, b2 = bn_params(ks[1], out_channels)      # bn2: BatchNorm2d(out_channels)
    s3, b3 = bn_params(ks[2], out_channels)      # bn3: BatchNorm2d(out_channels)
    # conv weights in HWIO layout (== torch weight.permute(2, 3, 1, 0))
    w1 = 0.1 * jax.random.normal(ks[3], (3, 3, in_channels, out_channels), jnp.float32)
    w2 = 0.1 * jax.random.normal(ks[4], (3, 3, out_channels, out_channels), jnp.float32)
    return dict(w1=w1, w2=w2, s1=s1, b1=b1, s2=s2, b2=b2, s3=s3, b3=b3)


def residual_block_ref(x_nchw, params):
    """Pure-JAX reference matching the kernel's numerics (same BN folding, bf16 MXU
    operands, f32 accumulation)."""
    x = jnp.transpose(x_nchw, (0, 2, 3, 1)).astype(jnp.float32)
    _, H, W, Cin = x.shape
    Cout = params["w1"].shape[-1]
    w1s, w2s, f, b3 = _fold_params(params, H, W)

    def q(v):  # same bf16 rounding the kernel applies to MXU operands
        return v.astype(jnp.bfloat16).astype(jnp.float32)

    h = lax.conv_general_dilated(q(x), q(w1s), (1, 1), [(1, 1), (1, 1)],
                                 dimension_numbers=("NHWC", "HWIO", "NHWC"),
                                 precision=lax.Precision.HIGHEST)
    h = jnp.maximum(h + f[None], 0.0)
    h = lax.conv_general_dilated(q(h), q(w2s), (1, 1), [(1, 1), (1, 1)],
                                 dimension_numbers=("NHWC", "HWIO", "NHWC"),
                                 precision=lax.Precision.HIGHEST)
    h = h + b3
    short = jnp.pad(x, ((0, 0), (0, 0), (0, 0), (0, Cout - Cin)))
    return jnp.transpose(h + short, (0, 3, 1, 2))


if __name__ == "__main__":
    key = jax.random.PRNGKey(0)
    kx, kp = jax.random.split(key)

    N, Cin, H, W = 2, 4, 16, 16
    Cout = 8                                        # PyramidNet: out_channels > in_channels
    x = jax.random.normal(kx, (N, Cin, H, W), jnp.float32)   # NCHW (PyTorch convention)
    params = init_params(kp, Cin, Cout)

    out = jax.block_until_ready(residual_block(x, params, stride=1))
    ref = jax.block_until_ready(residual_block_ref(x, params))

    assert out.shape == (N, Cout, H, W)
    # Tolerance covers bf16 MXU operands and f32 accumulation-order differences
    # between the band-Toeplitz matmul and XLA's conv.
    np.testing.assert_allclose(np.asarray(out), np.asarray(ref), atol=1e-2, rtol=1e-2)
    print("KERNEL_OK")
</pallas_src>

<mosaic_0001>
module attributes {stable_mosaic.version = 11 : i64} {
  func.func @_residual_block_kernel(%arg0: i32, %arg1: memref<1x16x128xf32, #tpu.memory_space<vmem>>, %arg2: memref<384x128xbf16, #tpu.memory_space<vmem>>, %arg3: memref<384x128xbf16, #tpu.memory_space<vmem>>, %arg4: memref<16x128xf32, #tpu.memory_space<vmem>>, %arg5: memref<1x128xf32, #tpu.memory_space<vmem>>, %arg6: memref<1x16x128xf32, #tpu.memory_space<vmem>>) attributes {dimension_semantics = [#tpu.dimension_semantics<parallel>], iteration_bounds = array<i64: 2>, scalar_prefetch = 0 : i64, scratch_operands = 0 : i64, tpu.core_type = #tpu.core_type<tc>, window_params = [{transform_indices = @transform_0, window_bounds = array<i64: 1, 16, 128>}, {pipeline_mode = #tpu.pipeline_mode<synchronous>, transform_indices = @transform_1, window_bounds = array<i64: 384, 128>}, {pipeline_mode = #tpu.pipeline_mode<synchronous>, transform_indices = @transform_2, window_bounds = array<i64: 384, 128>}, {pipeline_mode = #tpu.pipeline_mode<synchronous>, transform_indices = @transform_3, window_bounds = array<i64: 16, 128>}, {pipeline_mode = #tpu.pipeline_mode<synchronous>, transform_indices = @transform_4, window_bounds = array<i64: 1, 128>}, {transform_indices = @transform_5, window_bounds = array<i64: 1, 16, 128>}]} {
    %c0 = arith.constant 0 : index
    %c0_0 = arith.constant 0 : index
    %c0_1 = arith.constant 0 : index
    %0 = vector.load %arg1[%c0, %c0_0, %c0_1] : memref<1x16x128xf32, #tpu.memory_space<vmem>>, vector<1x16x128xf32>
    %1 = arith.truncf %0 : vector<1x16x128xf32> to vector<1x16x128xbf16>
    %cst = arith.constant 0.000000e+00 : bf16
    %2 = vector.broadcast %cst : bf16 to vector<1x1x128xbf16>
    %3 = vector.extract_strided_slice %1 {offsets = [0, 0, 0], sizes = [1, 15, 128], strides = [1, 1, 1]} : vector<1x16x128xbf16> to vector<1x15x128xbf16>
    %4 = tpu.concatenate %2, %3 in 1 : vector<1x1x128xbf16>, vector<1x15x128xbf16> -> vector<1x16x128xbf16>
    %5 = vector.extract_strided_slice %1 {offsets = [0, 1, 0], sizes = [1, 15, 128], strides = [1, 1, 1]} : vector<1x16x128xbf16> to vector<1x15x128xbf16>
    %6 = tpu.concatenate %5, %2 in 1 : vector<1x15x128xbf16>, vector<1x1x128xbf16> -> vector<1x16x128xbf16>
    %7 = tpu.concatenate %4, %1, %6 in 2 : vector<1x16x128xbf16>, vector<1x16x128xbf16>, vector<1x16x128xbf16> -> vector<1x16x384xbf16>
    %8 = vector.shape_cast %7 : vector<1x16x384xbf16> to vector<16x384xbf16>
    %c0_2 = arith.constant 0 : index
    %c0_3 = arith.constant 0 : index
    %9 = vector.load %arg2[%c0_2, %c0_3] : memref<384x128xbf16, #tpu.memory_space<vmem>>, vector<384x128xbf16>
    %cst_4 = arith.constant dense<0.000000e+00> : vector<16x128xf32>
    %10 = tpu.matmul %8, %9, %cst_4 {dimension_numbers = #tpu.dot_dimension_numbers<[1], [0], [0], [1], [0, 0, 1, 1], [], []>} : vector<16x384xbf16>, vector<384x128xbf16>, vector<16x128xf32> -> vector<16x128xf32>
    %11 = vector.shape_cast %10 : vector<16x128xf32> to vector<1x16x128xf32>
    %c0_5 = arith.constant 0 : index
    %c0_6 = arith.constant 0 : index
    %12 = vector.load %arg4[%c0_5, %c0_6] : memref<16x128xf32, #tpu.memory_space<vmem>>, vector<16x128xf32>
    %13 = vector.shape_cast %12 : vector<16x128xf32> to vector<1x16x128xf32>
    %14 = arith.addf %11, %13 : vector<1x16x128xf32>
    %cst_7 = arith.constant 0.000000e+00 : f32
    %15 = vector.broadcast %cst_7 : f32 to vector<1x16x128xf32>
    %16 = arith.maximumf %14, %15 : vector<1x16x128xf32>
    %17 = arith.truncf %16 : vector<1x16x128xf32> to vector<1x16x128xbf16>
    %cst_8 = arith.constant 0.000000e+00 : bf16
    %18 = vector.broadcast %cst_8 : bf16 to vector<1x1x128xbf16>
    %19 = vector.extract_strided_slice %17 {offsets = [0, 0, 0], sizes = [1, 15, 128], strides = [1, 1, 1]} : vector<1x16x128xbf16> to vector<1x15x128xbf16>
    %20 = tpu.concatenate %18, %19 in 1 : vector<1x1x128xbf16>, vector<1x15x128xbf16> -> vector<1x16x128xbf16>
    %21 = vector.extract_strided_slice %17 {offsets = [0, 1, 0], sizes = [1, 15, 128], strides = [1, 1, 1]} : vector<1x16x128xbf16> to vector<1x15x128xbf16>
    %22 = tpu.concatenate %21, %18 in 1 : vector<1x15x128xbf16>, vector<1x1x128xbf16> -> vector<1x16x128xbf16>
    %23 = tpu.concatenate %20, %17, %22 in 2 : vector<1x16x128xbf16>, vector<1x16x128xbf16>, vector<1x16x128xbf16> -> vector<1x16x384xbf16>
    %24 = vector.shape_cast %23 : vector<1x16x384xbf16> to vector<16x384xbf16>
    %c0_9 = arith.constant 0 : index
    %c0_10 = arith.constant 0 : index
    %25 = vector.load %arg3[%c0_9, %c0_10] : memref<384x128xbf16, #tpu.memory_space<vmem>>, vector<384x128xbf16>
    %cst_11 = arith.constant dense<0.000000e+00> : vector<16x128xf32>
    %26 = tpu.matmul %24, %25, %cst_11 {dimension_numbers = #tpu.dot_dimension_numbers<[1], [0], [0], [1], [0, 0, 1, 1], [], []>} : vector<16x384xbf16>, vector<384x128xbf16>, vector<16x128xf32> -> vector<16x128xf32>
    %27 = vector.shape_cast %26 : vector<16x128xf32> to vector<1x16x128xf32>
    %c0_12 = arith.constant 0 : index
    %c0_13 = arith.constant 0 : index
    %28 = vector.load %arg5[%c0_12, %c0_13] : memref<1x128xf32, #tpu.memory_space<vmem>>, vector<1x128xf32>
    %29 = vector.shape_cast %28 : vector<1x128xf32> to vector<1x1x128xf32>
    %30 = vector.broadcast %29 : vector<1x1x128xf32> to vector<1x16x128xf32>
    %31 = arith.addf %27, %30 : vector<1x16x128xf32>
    %32 = arith.addf %31, %0 : vector<1x16x128xf32>
    %c0_14 = arith.constant 0 : index
    %c0_15 = arith.constant 0 : index
    %c0_16 = arith.constant 0 : index
    %33 = vector.load %arg6[%c0_14, %c0_15, %c0_16] : memref<1x16x128xf32, #tpu.memory_space<vmem>>, vector<1x16x128xf32>
    tpu.vector_store %arg6[%c0_14, %c0_15, %c0_16], %32 {strides = array<i32>} : memref<1x16x128xf32, #tpu.memory_space<vmem>>, vector<1x16x128xf32>,
    return
  }
  func.func @transform_0(%arg0: i32) -> (i32, i32, i32) {
    %c0_i32 = arith.constant 0 : i32
    %c0_i32_0 = arith.constant 0 : i32
    %c0_i32_1 = arith.constant 0 : i32
    return %arg0, %c0_i32, %c0_i32_0 : i32, i32, i32
  }
  func.func @transform_1(%arg0: i32) -> (i32, i32) {
    %c0_i32 = arith.constant 0 : i32
    %c0_i32_0 = arith.constant 0 : i32
    %c0_i32_1 = arith.constant 0 : i32
    return %c0_i32, %c0_i32_0 : i32, i32
  }
  func.func @transform_2(%arg0: i32) -> (i32, i32) {
    %c0_i32 = arith.constant 0 : i32
    %c0_i32_0 = arith.constant 0 : i32
    %c0_i32_1 = arith.constant 0 : i32
    return %c0_i32, %c0_i32_0 : i32, i32
  }
  func.func @transform_3(%arg0: i32) -> (i32, i32) {
    %c0_i32 = arith.constant 0 : i32
    %c0_i32_0 = arith.constant 0 : i32
    %c0_i32_1 = arith.constant 0 : i32
    return %c0_i32, %c0_i32_0 : i32, i32
  }
  func.func @transform_4(%arg0: i32) -> (i32, i32) {
    %c0_i32 = arith.constant 0 : i32
    %c0_i32_0 = arith.constant 0 : i32
    %c0_i32_1 = arith.constant 0 : i32
    return %c0_i32, %c0_i32_0 : i32, i32
  }
  func.func @transform_5(%arg0: i32) -> (i32, i32, i32) {
    %c0_i32 = arith.constant 0 : i32
    %c0_i32_0 = arith.constant 0 : i32
    %c0_i32_1 = arith.constant 0 : i32
    return %arg0, %c0_i32, %c0_i32_0 : i32, i32, i32
  }
}

</mosaic_0001>

<bundles_post_ra>
// kernel: tpu_custom_call.1
= control target key start
LH: loop header
LB: loop body
LE: loop exit
PB: predicated region body
PF: predicated region fallthrough
CT: control target
= control target key end

     0   :  { %10 = vsyncpa [#allocation3], 0  ;;  %s1726_s0 = inlined_call_operand.hbm [shape: f32[2,16,128], index: 0, kind: input, shape index: {}]   ;;  %s1727_s1 = inlined_call_operand.hbm [shape: bf16[384,128], index: 1, kind: input, shape index: {}]   ;;  %s1728_s2 = inlined_call_operand.hbm [shape: bf16[384,128], index: 2, kind: input, shape index: {}]   ;;  %s1729_s3 = inlined_call_operand.hbm [shape: f32[16,128], index: 3, kind: input, shape index: {}]   ;;  %s1730_s4 = inlined_call_operand.vmem [shape: f32[1,128], index: 4, kind: input, shape index: {}]   ;;  %s1731_s5 = inlined_call_operand.hbm [shape: f32[2,16,128], index: 5, kind: output, shape index: {}]  }
   0x1   :  { %12 = vsyncpa [#allocation3 + $0x1], 0 }
   0x2   :  { %13 = vsyncpa [#allocation6], 0 }
   0x3   :  { %14 = vsyncpa [#allocation9], 0 }
   0x4   :  { %15 = vsyncpa [#allocation4], 0 }
   0x5   :  { %17 = vsyncpa [#allocation4 + $0x1], 0  ;;  %s1529_s18 = smov 0   ;;  %s1531_s19 = smov 0  }
   0x6   :  { %s1533_s20 = smov 0   ;;  %s1535_s21 = smov 0  }
   0x7 LB: > { %s1550_s22 = sadd.s32 4294967295, %s1488_s21   ;;  %s948_s23 = sadd.s32 4294967294, %s1488_s21   ;;  %s1488_s21 = sphi %s1535_s21, %s1748_s21   ;;  %s1484_s20 = sphi %s1533_s20, %s1747_s20   ;;  %s1480_s19 = sphi %s1531_s19, %s1746_s19   ;;  %s1476_s18 = sphi %s1529_s18, %s1745_s18  }
   0x8   : > { %p43_p0 = scmp.ne.s32.totalorder %s1480_s19, %s1476_s18  ;;  %p44_p1 = scmp.eq.s32.totalorder %s1550_s22, 0 }
   0x9   : > { %p151_p2 = scmp.eq.s32.totalorder %s1550_s22, 1  ;;  %p157_p3 = scmp.eq.s32.totalorder %s948_s23, 1 }
   0xa   : > { %p1559_p4 = por %p44_p1, %p43_p0  ;;  %p949_p5 = scmp.ge.s32.totalorder %s1488_s21, 1 }
   0xb   : > { %p1564_p6 = por %p157_p3, %p43_p0  ;;  %p164_p7 = scmp.lt.s32.totalorder %s1488_s21, 3 }
   0xc   : > { %s175_s28 = sshll.u32 %s1727_s1, 4  ;;  %s1490_s30 = smov [#allocation5]   ;;  %s176_s28 = int_to_ptr.hbm [resolvable:$true] %s175_s28 }
   0xd   : > { %p1572_p8 = pnand %p949_p5, %p164_p7  ;;  %s177_s6 = sshll.u32 %s1490_s30, 4  ;;  %s178_s6 = int_to_ptr.vmem [resolvable:$true] %s177_s6 }
   0xe   : > { %s189_s10 = sshll.u32 %s1728_s2, 4  ;;  %s1491_s11 = smov 64   ;;  %s190_s10 = int_to_ptr.hbm [resolvable:$true] %s189_s10 }
   0xf   : > { %p1226_p9 = pneg %p1572_p8  ;;  %s1492_s12 = smov 4  }
  0x10   : > { %s1493_s13 = smov [#allocation7]   ;;  %s203_s17 = sshll.u32 %s1729_s3, 4  ;;  %s204_s17 = int_to_ptr.hbm [resolvable:$true] %s203_s17 }
  0x11   : > { %p1580_p10 = pnand %p1226_p9, %p44_p1  ;;  %s191_s14 = sshll.u32 %s1493_s13, 4  ;;  %s192_s14 = int_to_ptr.vmem [resolvable:$true] %s191_s14 }
  0x12   : > { %s1494_s23 = smov [#allocation8]   ;;  %s1732_s27 = smov 128  }
  0x13   : > { %1229 = dma.hbm_to_vmem [thread:$0]  (!%p1580_p10), %s176_s28, 3072, %s178_s6, [#allocation6], %s1491_s11, %s1491_s11, %s1492_s12  }
  0x14   : > { %1232 = dma.hbm_to_vmem [thread:$0]  (!%p1580_p10), %s190_s10, 3072, %s192_s14, [#allocation6], %s1491_s11, %s1491_s11, %s1492_s12  }
  0x15   : > { %s205_s26 = sshll.u32 %s1494_s23, 4  ;;  %s1496_s28 = smov 8   ;;  %s206_s26 = int_to_ptr.vmem [resolvable:$true] %s205_s26 }
  0x16   : > { %1235 = dma.hbm_to_vmem [thread:$0]  (!%p1580_p10), %s204_s17, 256, %s206_s26, [#allocation9], %s1732_s27, %s1732_s27, %s1496_s28  }
  0x17   : > { %s1601_s30 = sadd.s32 1, %s1488_s21   ;;  %s30_s8 = sadd.s32 1, %s1484_s20 }
  0x18   : > { %s27_s6 = ssub.s32 %s1488_s21, %s1601_s30  ;;  %p37_p13 = scmp.ne.s32.totalorder %s1484_s20, %s1480_s19 }
  0x19   : > { %p28_p12 = scmp.eq.s32.totalorder %s27_s6, 0  ;;  %p38_p0 = scmp.eq.s32.totalorder %s1488_s21, 0 }
  0x1a   : > { %p1614_p3 = por %p151_p2, %p37_p13  ;;  %p1247_p5 = scmp.lt.s32.totalorder %s1488_s21, 2 }
  0x1b   : > { %s1610_s9 = scalar_select %p28_p12, %s1484_s20, %s30_s8  }
  0x1c   : > { %s222_s7 = sand.u32 1, %s1484_s20   ;;  %s1160_s11 = sshll.u32 %s1488_s21, 4 }
  0x1d   : > { %p39_p7 = por %p38_p0, %p37_p13  ;;  %s954_s12 = sshll.u32 %s222_s7, 4 }
  0x1e   : > { %s231_s15 = scalar_lea.hbm %s1726_s0, %s1160_s11  ;;  %s226_s17 = scalar_lea.vmem [#allocation2], %s954_s12 }
  0x1f   : > { %s232_s16 = sshll.u32 %s231_s15, 4  ;;  %s234_s23 = sshll.u32 %s226_s17, 4  ;;  %s233_s16 = int_to_ptr.hbm [resolvable:$true] %s232_s16  ;;  %s235_s23 = int_to_ptr.vmem [resolvable:$true] %s234_s23 }
  0x20   : > { %p1624_p9 = pnand %p1247_p5, %p39_p7  ;;  %s223_s6 = scalar_lea.sflag [#allocation3], %s222_s7 }
  0x21   : > { %s1384_s8 = sshra.s32 %s233_s16, 4  ;;  %s1391_s12 = scalar_lea.hbm %s1726_s0, 32  ;;  %s1385_s8 = int_to_ptr.hbm [resolvable:$true] %s1384_s8 }
  0x22   : > { %s1386_s27 = scalar_lea.hbm %s1385_s8, 16  ;;  %p1388_p10 = pneg %p1624_p9 }
  0x23   : > { %p1387_p2 = scmp.ne.s32.totalorder %s1385_s8, %s1386_s27  ;;  %p1392_p0 = scmp.lt.s32.totalorder %s1385_s8, %s1726_s0 }
  0x24   : > { %p1393_p5 = scmp.lt.s32.totalorder %s1391_s12, %s1386_s27 }
  0x25   : > { %p1389_p12 = pnand %p1388_p10, %p1387_p2 }
  0x26   : > { %p1394_p7 = por %p1393_p5, %p1392_p0 }
  0x27   : > { %p1390_p13 = pneg %p1389_p12 }
  0x29   : > { %p1395_p11 = pnand %p1394_p7, %p1390_p13 }
  0x2b   : > { %1398 = shalt.err (!%p1395_p11)
}
  0x2c   : > { %s1739_s7 = smov 128   ;;  %246 = sbr.rel (%p1572_p8) target bundleno = 399 (0x18f), region = 40 }
  0x2d   : > { %1239 = dma.hbm_to_vmem [thread:$0]  (!%p1624_p9), %s233_s16, 256, %s235_s23, %s223_s6, %s1739_s7, %s1739_s7, %s1496_s28  }
  0x2e   : > { %s1644_s17 = sand.u32 (!%p1572_p8), 1, %s1480_s19  }
  0x2f   : > { %s958_s27 = sshll.u32 (!%p1572_p8), %s1644_s17, 4  ;;  %s249_s8 = scalar_lea.sflag (!%p1572_p8), [#allocation3], %s1644_s17 }
  0x30   : > { %s252_s11 = scalar_lea.vmem (!%p1572_p8), [#allocation2], %s958_s27 }
  0x31   : > { %1459 = dma.done.wait (%p1559_p4), %s249_s8, 256  }
  0x32   : > { %1461 = vsyncadd (%p1559_p4), %s249_s8, 4294967040 }
  0x33   : > { %1463 = dma.done.wait (%p44_p1), [#allocation6], 6144  }
  0x34   : > { %1465 = vsyncadd (%p44_p1), [#allocation6], 4294961152 }
  0x35   : > { %1467 = dma.done.wait (%p44_p1), [#allocation9], 256  }
  0x36   : > { %1469 = vsyncadd (%p44_p1), [#allocation9], 4294967040  ;;  %v1168_v0 = vld [vmem:[#allocation5 + $0x38] sm:$0xff]  ;;  %v1167_v3 = vld [vmem:[#allocation5 + $0x30] sm:$0xff]  ;;  %vm313_vm0 = vcmask 1040384   ;;  %vm320_vm2 = vcmask 1047552  }
  0x37   : > { %v1176_v1 = vld [vmem:[#allocation5 + $0x78] sm:$0xff]  ;;  %517 = vmatpush.bf16.msra.mxu0 %v1168_v0  ;;  %v1175_v4 = vld [vmem:[#allocation5 + $0x70] sm:$0xff]  ;;  %v1166_v6 = vld [vmem:[#allocation5 + $0x28] sm:$0xff]  ;;  %vm314_vm1 = vsmask.f32 256  ;;  %s1209_s28 = sshll.u32 %s1550_s22, 4 }
  0x38   : > { %v1184_v2 = vld [vmem:[#allocation5 + $0xb8] sm:$0xff]  ;;  %531 = vmatpush.bf16.msra.mxu1 %v1176_v1  ;;  %v1183_v5 = vld [vmem:[#allocation5 + $0xb0] sm:$0xff]  ;;  %v1174_v7 = vld [vmem:[#allocation5 + $0x68] sm:$0xff]  ;;  %vm321_vm3 = vsmask.f32 7424  ;;  %s842_s26 = scalar_lea.hbm %s1731_s5, %s1209_s28  ;;  %s294_s6 = scalar_lea.vmem [#allocation10], %s958_s27 }
  0x39   : > { %545 = vmatpush.bf16.msra.mxu2 %v1184_v2  ;;  %v1182_v8 = vld [vmem:[#allocation5 + $0xa8] sm:$0xff]  ;;  %v1662_v9 = vld [vmem:[%s252_s11] sm:$0xff]  ;;  %v1164_v18 = vld [vmem:[#allocation5 + $0x18] sm:$0xff]  ;;  %s843_s13 = sshll.u32 %s294_s6, 4  ;;  %s845_s12 = sshll.u32 %s842_s26, 4  ;;  %s844_s13 = int_to_ptr.vmem [resolvable:$true] %s843_s13  ;;  %s846_s12 = int_to_ptr.hbm [resolvable:$true] %s845_s12 }
  0x3a   : > { %v1664_v10 = vld [vmem:[%s252_s11 + $0x8] sm:$0xff]  ;;  %v298_v11 = vpack.c.bf16 %v1662_v9, %v1662_v9  ;;  %v1165_v13 = vld [vmem:[#allocation5 + $0x20] sm:$0xff]  ;;  %v1163_v22 = vld [vmem:[#allocation5 + $0x10] sm:$0xff]  ;;  %s831_s22 = scalar_lea.sflag [#allocation4], %s1644_s17  ;;  %s1428_s14 = sshra.s32 %s846_s12, 4  ;;  %s1429_s14 = int_to_ptr.hbm [resolvable:$true] %s1428_s14 }
  0x3b   : > { %518 = vmatpush.bf16.msra.mxu0 %v1167_v3  ;;  %v299_v12 = vpack.c.bf16 %v1664_v10, %v1664_v10  ;;  %v1173_v14 = vld [vmem:[#allocation5 + $0x60] sm:$0xff]  ;;  %v1172_v19 = vld [vmem:[#allocation5 + $0x58] sm:$0xff]  ;;  %v1171_v23 = vld [vmem:[#allocation5 + $0x50] sm:$0xff]  ;;  %s1430_s15 = scalar_lea.hbm %s1429_s14, 16  ;;  %s1434_s8 = scalar_lea.hbm %s1731_s5, 32 }
  0x3c   : > { %532 = vmatpush.bf16.msra.mxu1 %v1175_v4  ;;  %v1181_v15 = vld [vmem:[#allocation5 + $0xa0] sm:$0xff]  ;;  %v302_v16 = vunpack.c.l.b16 %v298_v11  ;;  %v1180_v21 = vld [vmem:[#allocation5 + $0x98] sm:$0xff]  ;;  %v1179_v25 = vld [vmem:[#allocation5 + $0x90] sm:$0xff]  ;;  %p1431_p1 = scmp.ne.s32.totalorder %s1429_s14, %s1430_s15  ;;  %p1435_p11 = scmp.lt.s32.totalorder %s1429_s14, %s1731_s5 }
  0x3d   : > { %546 = vmatpush.bf16.msra.mxu2 %v1183_v5  ;;  %v303_v17 = vunpack.c.l.b16 %v299_v12  ;;  %v1162_v27 = vld [vmem:[#allocation5 + $0x8] sm:$0xff]  ;;  %v1161_v32 = vld [vmem:[#allocation5] sm:$0xff]  ;;  %vm1670_vm4 = vmand %vm313_vm0, %vm314_vm1  ;;  %p1436_p9 = scmp.lt.s32.totalorder %s1434_s8, %s1430_s15 }
  0x3e   : > { %v1170_v28 = vld [vmem:[#allocation5 + $0x48] sm:$0xff]  ;;  %v1169_v33 = vld [vmem:[#allocation5 + $0x40] sm:$0xff]  ;;  %v1200_v38 = vld [vmem:[#allocation7 + $0x78] sm:$0xff]  ;;  %p1432_p4 = pnand %p1431_p1, %p1614_p3 }
  0x3f   : > { %519 = vmatpush.bf16.msra.mxu0 %v1166_v6  ;;  %v304_v20 = vpack.c.b16 %v303_v17, %v302_v16  ;;  %v1178_v30 = vld [vmem:[#allocation5 + $0x88] sm:$0xff]  ;;  %v1177_v35 = vld [vmem:[#allocation5 + $0x80] sm:$0xff]  ;;  %vm1674_vm5 = vmand %vm320_vm2, %vm321_vm3  ;;  %p1437_p2 = por %p1436_p9, %p1435_p11 }
  0x40   : > { %533 = vmatpush.bf16.msra.mxu1 %v1174_v7  ;;  %v1199_v42 = vld [vmem:[#allocation7 + $0x70] sm:$0xff]  ;;  %v1192_v43 = vld [vmem:[#allocation7 + $0x38] sm:$0xff]  ;;  %v1198_v45 = vld [vmem:[#allocation7 + $0x68] sm:$0xff]  ;;  %p1433_p8 = pneg %p1432_p4 }
  0x41   : > { %547 = vmatpush.bf16.msra.mxu2 %v1182_v8  ;;  %v306_v24 = vshrl.u32 %v304_v20, 16  ;;  %v309_v26 = vshll.u32 %v304_v20, 16  ;;  %v1208_v44 = vld [vmem:[#allocation7 + $0xb8] sm:$0xff]  ;;  %778 = vmatpush.bf16.msra.mxu3 %v1192_v43  ;;  %v1191_v46 = vld [vmem:[#allocation7 + $0x30] sm:$0xff]  ;;  %v1197_v48 = vld [vmem:[#allocation7 + $0x60] sm:$0xff] }
  0x42   : > { %v1207_v47 = vld [vmem:[#allocation7 + $0xb0] sm:$0xff]  ;;  %v1190_v49 = vld [vmem:[#allocation7 + $0x28] sm:$0xff]  ;;  %v1196_v51 = vld [vmem:[#allocation7 + $0x58] sm:$0xff]  ;;  %p1438_p10 = pnand %p1437_p2, %p1433_p8 }
  0x43   : > { %520 = vmatpush.bf16.msra.mxu0 %v1165_v13  ;;  %v308_v29 = vrot.slane %v306_v24, 7  ;;  %v317_v31 = vrot.slane %v309_v26, 1  ;;  %v1206_v50 = vld [vmem:[#allocation7 + $0xa8] sm:$0xff]  ;;  %v1189_v52 = vld [vmem:[#allocation7 + $0x20] sm:$0xff]  ;;  %v1195_v54 = vld [vmem:[#allocation7 + $0x50] sm:$0xff] }
  0x44   : > { %534 = vmatpush.bf16.msra.mxu1 %v1173_v14  ;;  %v1205_v53 = vld [vmem:[#allocation7 + $0xa0] sm:$0xff]  ;;  %v1188_v55 = vld [vmem:[#allocation7 + $0x18] sm:$0xff]  ;;  %v1194_v57 = vld [vmem:[#allocation7 + $0x48] sm:$0xff] }
  0x45   : > { %548 = vmatpush.bf16.msra.mxu2 %v1181_v15  ;;  %v311_v34 = vor.u32 %v309_v26, %v308_v29  ;;  %v318_v37 = vor.u32 %v317_v31, %v306_v24  ;;  %779 = vmatpush.bf16.msra.mxu3 %v1191_v46  ;;  %v1204_v56 = vld [vmem:[#allocation7 + $0x98] sm:$0xff]  ;;  %v1187_v58 = vld [vmem:[#allocation7 + $0x10] sm:$0xff]  ;;  %v1193_v60 = vld [vmem:[#allocation7 + $0x40] sm:$0xff] }
  0x46   : > { %v1203_v59 = vld [vmem:[#allocation7 + $0x90] sm:$0xff]  ;;  %v1186_v61 = vld [vmem:[#allocation7 + $0x8] sm:$0xff]  ;;  %v1185_v63 = vld [vmem:[#allocation7] sm:$0xff] }
  0x47   : > { %521 = vmatpush.bf16.msra.mxu0 %v1164_v18  ;;  %v316_v40 = vsel %vm1670_vm4, 0, %v311_v34  ;;  %v323_v41 = vsel %vm1674_vm5, %v318_v37, 0  ;;  %v1202_v62 = vld [vmem:[#allocation7 + $0x88] sm:$0xff]  ;;  %v1201_v0 = vld [vmem:[#allocation7 + $0x80] sm:$0xff] }
  0x48   : > { %535 = vmatpush.bf16.msra.mxu1 %v1172_v19  ;;  %v559_v6 = vld [vmem:[#allocation8] sm:$0xff]  ;;  %v560_v14 = vld [vmem:[#allocation8 + $0x8] sm:$0xff] }
  0x49   : > { %549 = vmatpush.bf16.msra.mxu2 %v1180_v21  ;;  %780 = vmatpush.bf16.msra.mxu3 %v1190_v49  ;;  %v1293_v37 = vld [vmem:[%s1730_s4] ss:$0 sm:$0xff] }
  0x4b   : > { %522 = vmatpush.bf16.msra.mxu0 %v1163_v22 }
  0x4c   : > { %536 = vmatpush.bf16.msra.mxu1 %v1171_v23 }
  0x4d   : > { %550 = vmatpush.bf16.msra.mxu2 %v1179_v25  ;;  %781 = vmatpush.bf16.msra.mxu3 %v1189_v52 }
  0x4f   : > { %523 = vmatpush.bf16.msra.mxu0 %v1162_v27 }
  0x50   : > { %537 = vmatpush.bf16.msra.mxu1 %v1170_v28 }
  0x51   : > { %551 = vmatpush.bf16.msra.mxu2 %v1178_v30  ;;  %782 = vmatpush.bf16.msra.mxu3 %v1188_v55 }
  0x53   : > { %524 = vmatpush.bf16.msra.mxu0 %v1161_v32 }
  0x54   : > { %538 = vmatpush.bf16.msra.mxu1 %v1169_v33 }
  0x55   : > { %552 = vmatpush.bf16.msra.mxu2 %v1177_v35  ;;  %783 = vmatpush.bf16.msra.mxu3 %v1187_v58 }
  0x56   : > { %525 = vmatmul.bf16.vlgmr.msra.gmra.mxu0 %v316_v40 }
  0x57   : > { %792 = vmatpush.bf16.msrb.mxu0 %v1200_v38  ;;  %539 = vmatmul.bf16.vlgmr.msra.gmra.mxu1 %v304_v20 }
  0x58   : > { %553 = vmatmul.bf16.vlgmr.msra.gmra.mxu2 %v323_v41  ;;  %806 = vmatpush.bf16.msrb.mxu1 %v1208_v44 }
  0x59   : > { %784 = vmatpush.bf16.msra.mxu3 %v1186_v61 }
  0x5b   : > { %793 = vmatpush.bf16.msrb.mxu0 %v1199_v42 }
  0x5c   : > { %807 = vmatpush.bf16.msrb.mxu1 %v1207_v47 }
  0x5d   : > { %785 = vmatpush.bf16.msra.mxu3 %v1185_v63 }
  0x5f   : > { %794 = vmatpush.bf16.msrb.mxu0 %v1198_v45 }
  0x60   : > { %808 = vmatpush.bf16.msrb.mxu1 %v1206_v50 }
  0x63   : > { %795 = vmatpush.bf16.msrb.mxu0 %v1197_v48 }
  0x64   : > { %809 = vmatpush.bf16.msrb.mxu1 %v1205_v53 }
  0x67   : > { %796 = vmatpush.bf16.msrb.mxu0 %v1196_v51 }
  0x68   : > { %810 = vmatpush.bf16.msrb.mxu1 %v1204_v56 }
  0x6b   : > { %797 = vmatpush.bf16.msrb.mxu0 %v1195_v54 }
  0x6c   : > { %811 = vmatpush.bf16.msrb.mxu1 %v1203_v59 }
  0x6f   : > { %798 = vmatpush.bf16.msrb.mxu0 %v1194_v57 }
  0x70   : > { %812 = vmatpush.bf16.msrb.mxu1 %v1202_v62 }
  0x73   : > { %799 = vmatpush.bf16.msrb.mxu0 %v1193_v60 }
  0x74   : > { %813 = vmatpush.bf16.msrb.mxu1 %v1201_v0 }
  0xd3   : > { %v526_v1 = vpop.f32.mrf.mxu0 }
  0xd4   : > { %v540_v2 = vpop.f32.mrf.mxu1 }
  0xd5   : > { %v541_v3 = vadd.f32 %v540_v2, %v526_v1 }
  0xdb   : > { %v554_v4 = vpop.f32.mrf.mxu2  ;;  %v528_v7 = vpop.f32.mrf.mxu0 }
  0xdc   : > { %v555_v5 = vadd.f32 %v554_v4, %v541_v3  ;;  %v542_v8 = vpop.f32.mrf.mxu1 }
  0xdd   : > { %v543_v12 = vadd.f32 %v542_v8, %v528_v7 }
  0xde   : > { %v561_v11 = vadd.f32 %v559_v6, %v555_v5 }
  0xe0   : > { %v563_v15 = vmax.f32 %v561_v11, 0.0 }
  0xe2   : > { %v565_v18 = vpack.c.bf16 %v563_v15, %v563_v15 }
  0xe3   : > { %v556_v13 = vpop.f32.mrf.mxu2 }
  0xe4   : > { %v557_v16 = vadd.f32 %v556_v13, %v543_v12  ;;  %v569_v21 = vunpack.c.l.b16 %v565_v18 }
  0xe6   : > { %v562_v17 = vadd.f32 %v560_v14, %v557_v16 }
  0xe8   : > { %v564_v19 = vmax.f32 %v562_v17, 0.0 }
  0xea   : > { %v566_v20 = vpack.c.bf16 %v564_v19, %v564_v19 }
  0xec   : > { %v570_v22 = vunpack.c.l.b16 %v566_v20 }
  0xee   : > { %v571_v23 = vpack.c.b16 %v570_v22, %v569_v21 }
  0xf0   : > { %800 = vmatmul.bf16.vlgmr.msrb.gmra.mxu0 %v571_v23  ;;  %v573_v24 = vshrl.u32 %v571_v23, 16  ;;  %v576_v25 = vshll.u32 %v571_v23, 16 }
  0xf2   : > { %v575_v26 = vrot.slane %v573_v24, 7  ;;  %v581_v27 = vrot.slane %v576_v25, 1 }
  0xf4   : > { %v578_v28 = vor.u32 %v576_v25, %v575_v26  ;;  %v582_v29 = vor.u32 %v581_v27, %v573_v24 }
  0xf6   : > { %v580_v30 = vsel %vm1670_vm4, 0, %v578_v28  ;;  %v584_v31 = vsel %vm1674_vm5, %v582_v29, 0 }
  0xf7   : > { %786 = vmatmul.bf16.vlgmr.msra.gmra.mxu3 %v580_v30  ;;  %814 = vmatmul.bf16.vlgmr.msrb.gmra.mxu1 %v584_v31 }
 0x16d   : > { %v801_v32 = vpop.f32.mrf.mxu0 }
 0x174   : > { %v815_v33 = vpop.f32.mrf.mxu1 }
 0x175   : > { %v803_v41 = vpop.f32.mrf.mxu0 }
 0x17a   : > { %v787_v34 = vpop.f32.mrf.mxu3 }
 0x17b   : > { %v802_v35 = vadd.f32 %v801_v32, %v787_v34 }
 0x17c   : > { %v817_v43 = vpop.f32.mrf.mxu1 }
 0x17d   : > { %v816_v38 = vadd.f32 %v815_v33, %v802_v35 }
 0x17f   : > { %v824_v40 = vadd.f32 %v1293_v37, %v816_v38 }
 0x181   : > { %v826_v36 = vadd.f32 %v824_v40, %v1662_v9 }
 0x182   : > { %v789_v39 = vpop.f32.mrf.mxu3 }
 0x183   : > { %828 = vst [vmem:[%s294_s6] sm:$0xff] %v826_v36  ;;  %v804_v42 = vadd.f32 %v803_v41, %v789_v39 }
 0x185   : > { %v818_v44 = vadd.f32 %v817_v43, %v804_v42 }
 0x187   : > { %v825_v45 = vadd.f32 %v1293_v37, %v818_v44 }
 0x189   : > { %v827_v9 = vadd.f32 %v825_v45, %v1664_v10 }
 0x18b   : > { %829 = vst [vmem:[%s294_s6 + $0x8] sm:$0xff] %v827_v9 }
 0x18c   : > { %1441 = shalt.err (!%p1438_p10)
}
 0x18d   : > { %s1497_s17 = smov 128   ;;  %s1498_s29 = smov 8  }
 0x18e   : > { %1224 = dma.vmem_to_hbm [thread:$0]  (%p1614_p3), %s844_s13, 256, %s846_s12, %s831_s22, %s1497_s17, %s1497_s17, %s1498_s29  }
 0x18f PF: > { %s860_s28 = sand.u32 1, %s1476_s18   ;;  %p1744_p12 = scmp.ge.s32.totalorder %s1488_s21, 2 }
 0x190   : > { %s861_s16 = scalar_lea.sflag [#allocation4], %s860_s28 }
 0x191   : > { %p1241_p13 = pnand %p1744_p12, %p1564_p6 }
 0x193   : > { %p1242_p0 = pneg %p1241_p13 }
 0x195   : > { %1471 = dma.done.wait (%p1242_p0), %s861_s16, 256  }
 0x196   : > { %1473 = vsyncadd (%p1242_p0), %s861_s16, 4294967040  ;;  %p20_p5 = scmp.ge.s32.totalorder %s1601_s30, 4   ;;  %s1745_s18 = smov %s1480_s19 }
 0x197   : > { %s1746_s19 = smov %s1484_s20  ;;  %s1747_s20 = smov %s1610_s9 }
 0x198   : > { %s1748_s21 = smov %s1601_s30  ;;  %22 = sbr.rel (!%p20_p5) target bundleno = 7 (0x7), region = 97 }
 0x19d   :  { %867 = vsyncpa [#allocation3], 1 }
 0x19e   :  { %869 = vsyncpa [#allocation3 + $0x1], 1 }
 0x19f   :  { %870 = vsyncpa [#allocation6], 1 }
 0x1a0   :  { %871 = vsyncpa [#allocation9], 1 }
 0x1a1   :  { %872 = vsyncpa [#allocation4], 1 }
 0x1a2   :  { %874 = vsyncpa [#allocation4 + $0x1], 1 }

</bundles_post_ra>
